<compile_context>
chip_gen: v7x
topology: tpu7x:2x2x1
jax: 0.10.0
libtpu: 0.0.40
codegen_flags: <defaults>
</compile_context>

<pallas_src>
import functools

import jax
import jax.numpy as jnp
from jax.experimental import pallas as pl
from jax.experimental.pallas import tpu as pltpu


def _round_up(x, m):
    return (x + m - 1) // m * m


def _device_defaults():
    """(vmem_capacity_bytes, mxu_rows) with conservative fallbacks."""
    vmem_bytes = 64 << 20   # v7x-safe default
    mxu_rows = 256
    try:
        kind = jax.devices()[0].device_kind.lower()
        if ("v5 lite" in kind) or ("v5e" in kind) or ("v5litepod" in kind):
            vmem_bytes = 128 << 20
            mxu_rows = 128
        elif ("v6" in kind) or ("trillium" in kind):
            vmem_bytes = 128 << 20
            mxu_rows = 256
    except Exception:
        pass
    return vmem_bytes, mxu_rows


def _vmem_need(tk, b_tile, h_pad, p):
    """Conservative double-buffered VMEM footprint for the chosen tiles."""
    return (2 * b_tile * tk * 2          # x block (bf16, double buffered)
            + 2 * tk * h_pad * 2         # We block (bf16, double buffered)
            + 2 * h_pad * p * 2          # fused head W (bf16)
            + 2 * h_pad * 4 + 2 * p * 4  # biases (f32)
            + b_tile * h_pad * 4         # f32 accumulator scratch
            + 2 * b_tile * p * 4)        # out block (f32, double buffered)


def _pick_tk(f_pad, h_pad, b_tile, p, budget_bytes):
    """Largest K tile (prefer single-K) that fits the VMEM budget."""
    cands = []
    if f_pad <= 4096:
        cands.append(f_pad)              # single-K grid if it fits
    cands += [t for t in (2048, 1024, 512, 256, 128)
              if t < f_pad and f_pad % t == 0]
    for tk in cands:
        if _vmem_need(tk, b_tile, h_pad, p) <= budget_bytes:
            return tk
    return 128


# ---------------------------------------------------------------------------
# Kernels
# ---------------------------------------------------------------------------

def _finish(hidden, wh_ref, bh_ref, out_ref, action_size):
    """hidden -> fused (policy|value) head -> lane-dense [Bt, P] output slab."""
    logits = jnp.dot(hidden.astype(wh_ref.dtype), wh_ref[...],
                     preferred_element_type=jnp.float32) + bh_ref[...]
    bt, p = logits.shape
    col = jax.lax.broadcasted_iota(jnp.int32, (bt, p), 1)

    # log_softmax over the real action columns only (padded cols -> -inf).
    masked = jnp.where(col < action_size, logits, -jnp.inf)
    m = jnp.max(masked, axis=-1, keepdims=True)
    shifted = masked - m
    lse = jnp.log(jnp.sum(jnp.exp(shifted), axis=-1, keepdims=True))
    logp = shifted - lse

    # cols [0, A): log_probs; col A: value (logits already holds it);
    # remaining padded cols: junk (sliced off outside).
    out_ref[...] = jnp.where(col == action_size, logits, logp)


def _policy_kernel_single_k(x_ref, we_ref, be_ref, wh_ref, bh_ref, out_ref,
                            *, action_size):
    """Grid = (batch_tiles,).  Whole F resident: no accumulator, no branches."""
    hidden = jnp.maximum(
        jnp.dot(x_ref[...], we_ref[...], preferred_element_type=jnp.float32)
        + be_ref[...], 0.0)
    _finish(hidden, wh_ref, bh_ref, out_ref, action_size)


def _policy_kernel_multi_k(x_ref, we_ref, be_ref, wh_ref, bh_ref, out_ref,
                           acc_ref, *, action_size):
    """Grid = (batch_tiles, k_tiles).  Accumulate x@We over k, finish at last k."""
    k = pl.program_id(1)
    partial = jnp.dot(x_ref[...], we_ref[...],
                      preferred_element_type=jnp.float32)

    @pl.when(k == 0)
    def _():
        acc_ref[...] = partial            # direct first write (no zero-init pass)

    @pl.when(k > 0)
    def _():
        acc_ref[...] += partial

    @pl.when(k == pl.num_programs(1) - 1)
    def _():
        hidden = jnp.maximum(acc_ref[...] + be_ref[...], 0.0)
        _finish(hidden, wh_ref, bh_ref, out_ref, action_size)


# ---------------------------------------------------------------------------
# Host-side: one-time parameter preparation + per-call forward
# ---------------------------------------------------------------------------

def prepare_params(params):
    """One-time pad/cast of weights; call once and reuse across forward calls."""
    we, be, wp, bp, wv, bv = params            # all stored [in, out]
    F, H = we.shape
    A = wp.shape[1]
    F_pad = _round_up(F, 128)
    H_pad = _round_up(H, 128)
    P = _round_up(A + 1, 128)                  # fused (policy + value) lane width

    we_pad = jnp.zeros((F_pad, H_pad), jnp.bfloat16)
    we_pad = we_pad.at[:F, :H].set(we.astype(jnp.bfloat16))
    be_pad = jnp.zeros((1, H_pad), jnp.float32).at[:, :H].set(
        be.reshape(1, H).astype(jnp.float32))

    # Fused head: cols [0, A) = policy, col A = value, rest zero.
    wh = jnp.zeros((H_pad, P), jnp.bfloat16)
    wh = wh.at[:H, :A].set(wp.astype(jnp.bfloat16))
    wh = wh.at[:H, A:A + 1].set(wv.astype(jnp.bfloat16))
    bh = jnp.zeros((1, P), jnp.float32)
    bh = bh.at[:, :A].set(bp.reshape(1, A).astype(jnp.float32))
    bh = bh.at[:, A:A + 1].set(bv.reshape(1, 1).astype(jnp.float32))

    return {
        "we": we_pad, "be": be_pad, "wh": wh, "bh": bh,
        "feat_dim": F, "hidden_dim": H, "action_size": A,
        "F_pad": F_pad, "H_pad": H_pad, "P": P,
    }


def categorical_policy_forward(x_nchw, prepared, hx, masks):
    """Returns (log_probs [B, A], value [B], hx)."""
    del masks  # non-recurrent path; see TODO(synk) above.
    B = x_nchw.shape[0]
    F = prepared["feat_dim"]
    A = prepared["action_size"]
    F_pad, H_pad, P = prepared["F_pad"], prepared["H_pad"], prepared["P"]

    vmem_bytes, mxu_rows = _device_defaults()

    # Batch tiling: bf16 packs 16 sublanes per vreg -> round small B to 16.
    if B <= 128:
        B_TILE = _round_up(max(B, 16), 16)
        B_pad = B_TILE
    else:
        if mxu_rows >= 256 and B >= 512:
            B_TILE = 256                       # fills a 256x256 MXU (v6e/v7x)
        else:
            B_TILE = 128                       # v5e 4x128x128 MXU
        B_pad = _round_up(B, B_TILE)

    budget = int(vmem_bytes * 0.6)             # headroom under scoped VMEM
    TK = _pick_tk(F_pad, H_pad, B_TILE, P, budget)
    n_b = B_pad // B_TILE
    n_k = F_pad // TK

    # Activations: cast to bf16; pad only if actually needed.
    x_flat = x_nchw.reshape(B, -1).astype(jnp.bfloat16)
    if B_pad == B and F_pad == F:
        x_pad = x_flat
    else:
        x_pad = jnp.pad(x_flat, ((0, B_pad - B), (0, F_pad - F)))

    flops = 2 * B_pad * F_pad * H_pad + 2 * B_pad * H_pad * P
    bytes_accessed = (B_pad * F_pad * 2 + F_pad * H_pad * 2 + H_pad * 4
                      + H_pad * P * 2 + P * 4 + B_pad * P * 4)
    cost = pl.CostEstimate(flops=flops, transcendentals=B_pad * P,
                           bytes_accessed=bytes_accessed)

    vmem_limit = min(int(vmem_bytes * 0.9),
                     max(32 << 20, _vmem_need(TK, B_TILE, H_pad, P) + (4 << 20)))

    args = (x_pad, prepared["we"], prepared["be"], prepared["wh"], prepared["bh"])
    out_shape = jax.ShapeDtypeStruct((B_pad, P), jnp.float32)

    if n_k == 1:
        out = pl.pallas_call(
            functools.partial(_policy_kernel_single_k, action_size=A),
            out_shape=out_shape,
            grid_spec=pltpu.PrefetchScalarGridSpec(
                num_scalar_prefetch=0,
                grid=(n_b,),
                in_specs=[
                    pl.BlockSpec((B_TILE, F_pad), lambda i: (i, 0)),   # x
                    pl.BlockSpec((F_pad, H_pad), lambda i: (0, 0)),    # We
                    pl.BlockSpec((1, H_pad), lambda i: (0, 0)),        # be
                    pl.BlockSpec((H_pad, P), lambda i: (0, 0)),        # head W
                    pl.BlockSpec((1, P), lambda i: (0, 0)),            # head b
                ],
                out_specs=pl.BlockSpec((B_TILE, P), lambda i: (i, 0)),
            ),
            compiler_params=pltpu.CompilerParams(
                dimension_semantics=("parallel",),
                vmem_limit_bytes=vmem_limit),
            cost_estimate=cost,
        )(*args)
    else:
        out = pl.pallas_call(
            functools.partial(_policy_kernel_multi_k, action_size=A),
            out_shape=out_shape,
            grid_spec=pltpu.PrefetchScalarGridSpec(
                num_scalar_prefetch=0,
                grid=(n_b, n_k),
                in_specs=[
                    pl.BlockSpec((B_TILE, TK), lambda i, k: (i, k)),   # x
                    pl.BlockSpec((TK, H_pad), lambda i, k: (k, 0)),    # We
                    pl.BlockSpec((1, H_pad), lambda i, k: (0, 0)),     # be
                    pl.BlockSpec((H_pad, P), lambda i, k: (0, 0)),     # head W
                    pl.BlockSpec((1, P), lambda i, k: (0, 0)),         # head b
                ],
                out_specs=pl.BlockSpec((B_TILE, P), lambda i, k: (i, 0)),
                scratch_shapes=[pltpu.VMEM((B_TILE, H_pad), jnp.float32)],
            ),
            compiler_params=pltpu.CompilerParams(
                dimension_semantics=("parallel", "arbitrary"),
                vmem_limit_bytes=vmem_limit),
            cost_estimate=cost,
        )(*args)

    log_probs = out[:B, :A]            # Categorical(logits=log_probs) repr
    value = out[:B, A]                 # v = fc_value(hidden).reshape(-1)
    return log_probs, value, hx


# ---------------------------------------------------------------------------
# Init / reference / self-test
# ---------------------------------------------------------------------------

def _orthogonal(key, out_dim, in_dim, gain):
    """Deterministic orthogonal init (torch-style), returns [out_dim, in_dim]."""
    big, small = max(out_dim, in_dim), min(out_dim, in_dim)
    a = jax.random.normal(key, (big, small), dtype=jnp.float32)
    q, r = jnp.linalg.qr(a)
    q = q * jnp.sign(jnp.diagonal(r))[None, :]
    w = q if out_dim >= in_dim else q.T
    return gain * w


def make_params(key, feat_dim, hidden_dim, action_size):
    k_e, k_p, k_v = jax.random.split(key, 3)
    w_e = _orthogonal(k_e, hidden_dim, feat_dim, gain=jnp.sqrt(2.0))  # relu gain
    b_e = jnp.zeros((1, hidden_dim), jnp.float32)
    w_p = _orthogonal(k_p, action_size, hidden_dim, gain=0.01)
    b_p = jnp.zeros((1, action_size), jnp.float32)
    w_v = _orthogonal(k_v, 1, hidden_dim, gain=1.0)
    b_v = jnp.zeros((1, 1), jnp.float32)
    # store [in, out] so the kernel never transposes
    return (w_e.T, b_e, w_p.T, b_p, w_v.T, b_v)


def _reference_forward(x_nchw, params):
    """Pure-JAX reference with the same bf16 matmul inputs / f32 math."""
    we, be, wp, bp, wv, bv = params
    xf = x_nchw.reshape(x_nchw.shape[0], -1).astype(jnp.bfloat16)
    hidden = jnp.maximum(
        jnp.dot(xf, we.astype(jnp.bfloat16),
                preferred_element_type=jnp.float32) + be, 0.0)
    h16 = hidden.astype(jnp.bfloat16)
    logits = jnp.dot(h16, wp.astype(jnp.bfloat16),
                     preferred_element_type=jnp.float32) + bp
    logp = jax.nn.log_softmax(logits, axis=1)
    v = (jnp.dot(h16, wv.astype(jnp.bfloat16),
                 preferred_element_type=jnp.float32) + bv).reshape(-1)
    return logp, v


if __name__ == "__main__":
    B, C, Himg, Wimg = 2, 4, 16, 16
    hidden_dim = 32
    action_size = 16

    key = jax.random.PRNGKey(0)
    k_x, k_params = jax.random.split(key)

    x = jax.random.normal(k_x, (B, C, Himg, Wimg), dtype=jnp.float32)
    params = make_params(k_params, C * Himg * Wimg, hidden_dim, action_size)
    prepared = prepare_params(params)          # one-time weight pad/cast
    hx = jnp.zeros((B, hidden_dim), jnp.float32)
    masks = jnp.ones((B,), jnp.float32)

    log_probs, value, hx_out = categorical_policy_forward(x, prepared, hx, masks)
    jax.block_until_ready((log_probs, value, hx_out))

    # sanity: shapes + log_probs rows must sum to 1 in prob space
    assert log_probs.shape == (B, action_size)
    assert value.shape == (B,)
    row_sums = jnp.exp(log_probs).sum(axis=1)
    assert bool(jnp.all(jnp.abs(row_sums - 1.0) < 1e-4))

    # sanity: matches a pure-JAX bf16/f32 reference
    ref_logp, ref_v = _reference_forward(x, params)
    assert bool(jnp.all(jnp.abs(log_probs - ref_logp) < 1e-2))
    assert bool(jnp.all(jnp.abs(value - ref_v) < 5e-2))

    print("KERNEL_OK")
</pallas_src>

<mosaic_0001>
module attributes {stable_mosaic.version = 11 : i64} {
  func.func @_policy_kernel_single_k(%arg0: i32, %arg1: memref<16x1024xbf16, #tpu.memory_space<vmem>>, %arg2: memref<1024x128xbf16, #tpu.memory_space<vmem>>, %arg3: memref<1x128xf32, #tpu.memory_space<vmem>>, %arg4: memref<128x128xbf16, #tpu.memory_space<vmem>>, %arg5: memref<1x128xf32, #tpu.memory_space<vmem>>, %arg6: memref<16x128xf32, #tpu.memory_space<vmem>>) attributes {dimension_semantics = [#tpu.dimension_semantics<parallel>], iteration_bounds = array<i64: 1>, scalar_prefetch = 0 : i64, scratch_operands = 0 : i64, tpu.core_type = #tpu.core_type<tc>, window_params = [{transform_indices = @transform_0, window_bounds = array<i64: 16, 1024>}, {pipeline_mode = #tpu.pipeline_mode<synchronous>, transform_indices = @transform_1, window_bounds = array<i64: 1024, 128>}, {pipeline_mode = #tpu.pipeline_mode<synchronous>, transform_indices = @transform_2, window_bounds = array<i64: 1, 128>}, {pipeline_mode = #tpu.pipeline_mode<synchronous>, transform_indices = @transform_3, window_bounds = array<i64: 128, 128>}, {pipeline_mode = #tpu.pipeline_mode<synchronous>, transform_indices = @transform_4, window_bounds = array<i64: 1, 128>}, {transform_indices = @transform_5, window_bounds = array<i64: 16, 128>}]} {
    %c0 = arith.constant 0 : index
    %c0_0 = arith.constant 0 : index
    %0 = vector.load %arg1[%c0, %c0_0] : memref<16x1024xbf16, #tpu.memory_space<vmem>>, vector<16x1024xbf16>
    %c0_1 = arith.constant 0 : index
    %c0_2 = arith.constant 0 : index
    %1 = vector.load %arg2[%c0_1, %c0_2] : memref<1024x128xbf16, #tpu.memory_space<vmem>>, vector<1024x128xbf16>
    %cst = arith.constant dense<0.000000e+00> : vector<16x128xf32>
    %2 = tpu.matmul %0, %1, %cst {dimension_numbers = #tpu.dot_dimension_numbers<[1], [0], [0], [1], [0, 0, 1, 1], [], []>} : vector<16x1024xbf16>, vector<1024x128xbf16>, vector<16x128xf32> -> vector<16x128xf32>
    %c0_3 = arith.constant 0 : index
    %c0_4 = arith.constant 0 : index
    %3 = vector.load %arg3[%c0_3, %c0_4] : memref<1x128xf32, #tpu.memory_space<vmem>>, vector<1x128xf32>
    %4 = vector.broadcast %3 : vector<1x128xf32> to vector<16x128xf32>
    %5 = arith.addf %2, %4 : vector<16x128xf32>
    %cst_5 = arith.constant 0.000000e+00 : f32
    %6 = vector.broadcast %cst_5 : f32 to vector<16x128xf32>
    %7 = arith.maximumf %5, %6 : vector<16x128xf32>
    %8 = arith.truncf %7 : vector<16x128xf32> to vector<16x128xbf16>
    %c0_6 = arith.constant 0 : index
    %c0_7 = arith.constant 0 : index
    %9 = vector.load %arg4[%c0_6, %c0_7] : memref<128x128xbf16, #tpu.memory_space<vmem>>, vector<128x128xbf16>
    %cst_8 = arith.constant dense<0.000000e+00> : vector<16x128xf32>
    %10 = tpu.matmul %8, %9, %cst_8 {dimension_numbers = #tpu.dot_dimension_numbers<[1], [0], [0], [1], [0, 0, 1, 1], [], []>} : vector<16x128xbf16>, vector<128x128xbf16>, vector<16x128xf32> -> vector<16x128xf32>
    %c0_9 = arith.constant 0 : index
    %c0_10 = arith.constant 0 : index
    %11 = vector.load %arg5[%c0_9, %c0_10] : memref<1x128xf32, #tpu.memory_space<vmem>>, vector<1x128xf32>
    %12 = vector.broadcast %11 : vector<1x128xf32> to vector<16x128xf32>
    %13 = arith.addf %10, %12 : vector<16x128xf32>
    %14 = tpu.iota {dimensions = array<i32: 1>} : vector<16x128xi32>
    %c16_i32 = arith.constant 16 : i32
    %15 = vector.broadcast %c16_i32 : i32 to vector<16x128xi32>
    %16 = arith.cmpi slt, %14, %15 : vector<16x128xi32>
    %cst_11 = arith.constant 0xFF800000 : f32
    %17 = vector.broadcast %cst_11 : f32 to vector<16x128xf32>
    %18 = arith.select %16, %13, %17 : vector<16x128xi1>, vector<16x128xf32>
    %cst_12 = arith.constant dense<0xFF800000> : vector<16xf32>
    %19 = vector.multi_reduction <maximumf>, %18, %cst_12 [1] : vector<16x128xf32> to vector<16xf32>
    %20 = vector.shape_cast %19 : vector<16xf32> to vector<16x1xf32>
    %21 = vector.broadcast %20 : vector<16x1xf32> to vector<16x128xf32>
    %22 = arith.subf %18, %21 : vector<16x128xf32>
    %23 = math.exp %22 : vector<16x128xf32>
    %cst_13 = arith.constant dense<0.000000e+00> : vector<16xf32>
    %24 = vector.multi_reduction <add>, %23, %cst_13 [1] : vector<16x128xf32> to vector<16xf32>
    %25 = vector.shape_cast %24 : vector<16xf32> to vector<16x1xf32>
    %26 = math.log %25 : vector<16x1xf32>
    %27 = vector.broadcast %26 : vector<16x1xf32> to vector<16x128xf32>
    %28 = arith.subf %22, %27 : vector<16x128xf32>
    %c16_i32_14 = arith.constant 16 : i32
    %29 = vector.broadcast %c16_i32_14 : i32 to vector<16x128xi32>
    %30 = arith.cmpi eq, %14, %29 : vector<16x128xi32>
    %31 = arith.select %30, %13, %28 : vector<16x128xi1>, vector<16x128xf32>
    %c0_15 = arith.constant 0 : index
    %c0_16 = arith.constant 0 : index
    %32 = vector.load %arg6[%c0_15, %c0_16] : memref<16x128xf32, #tpu.memory_space<vmem>>, vector<16x128xf32>
    tpu.vector_store %arg6[%c0_15, %c0_16], %31 {strides = array<i32>} : memref<16x128xf32, #tpu.memory_space<vmem>>, vector<16x128xf32>,
    return
  }
  func.func @transform_0(%arg0: i32) -> (i32, i32) {
    %c0_i32 = arith.constant 0 : i32
    %c0_i32_0 = arith.constant 0 : i32
    return %arg0, %c0_i32 : i32, i32
  }
  func.func @transform_1(%arg0: i32) -> (i32, i32) {
    %c0_i32 = arith.constant 0 : i32
    %c0_i32_0 = arith.constant 0 : i32
    %c0_i32_1 = arith.constant 0 : i32
    return %c0_i32, %c0_i32_0 : i32, i32
  }
  func.func @transform_2(%arg0: i32) -> (i32, i32) {
    %c0_i32 = arith.constant 0 : i32
    %c0_i32_0 = arith.constant 0 : i32
    %c0_i32_1 = arith.constant 0 : i32
    return %c0_i32, %c0_i32_0 : i32, i32
  }
  func.func @transform_3(%arg0: i32) -> (i32, i32) {
    %c0_i32 = arith.constant 0 : i32
    %c0_i32_0 = arith.constant 0 : i32
    %c0_i32_1 = arith.constant 0 : i32
    return %c0_i32, %c0_i32_0 : i32, i32
  }
  func.func @transform_4(%arg0: i32) -> (i32, i32) {
    %c0_i32 = arith.constant 0 : i32
    %c0_i32_0 = arith.constant 0 : i32
    %c0_i32_1 = arith.constant 0 : i32
    return %c0_i32, %c0_i32_0 : i32, i32
  }
  func.func @transform_5(%arg0: i32) -> (i32, i32) {
    %c0_i32 = arith.constant 0 : i32
    %c0_i32_0 = arith.constant 0 : i32
    return %arg0, %c0_i32 : i32, i32
  }
}

</mosaic_0001>

<bundles_post_ra>
// kernel: tpu_custom_call.1
= control target key start
LH: loop header
LB: loop body
LE: loop exit
PB: predicated region body
PF: predicated region fallthrough
CT: control target
= control target key end

     0   :  { %10 = vsyncpa [#allocation3], 0  ;;  %s1444_s0 = inlined_call_operand.hbm [shape: bf16[16,1024], index: 0, kind: input, shape index: {}]   ;;  %s1445_s1 = inlined_call_operand.hbm [shape: bf16[1024,128], index: 1, kind: input, shape index: {}]   ;;  %s1446_s2 = inlined_call_operand.vmem [shape: f32[1,128], index: 2, kind: input, shape index: {}]   ;;  %s1447_s3 = inlined_call_operand.hbm [shape: bf16[128,128], index: 3, kind: input, shape index: {}]   ;;  %s1448_s4 = inlined_call_operand.vmem [shape: f32[1,128], index: 4, kind: input, shape index: {}]   ;;  %s1449_s5 = inlined_call_operand.hbm [shape: f32[16,128], index: 5, kind: output, shape index: {}]  }
   0x1   :  { %11 = vsyncpa [#allocation6], 0 }
   0x2   :  { %12 = vsyncpa [#allocation4], 0  ;;  %s1342_s18 = smov [#allocation5]   ;;  %s1248_s22 = scalar_lea.hbm %s1445_s1, 8192 }
   0x3   :  { %s30_s19 = sshll.u32 %s1342_s18, 4  ;;  %p1249_p0 = scmp.ne.s32.totalorder %s1445_s1, %s1248_s22  ;;  %s31_s19 = int_to_ptr.vmem [resolvable:$true] %s30_s19 }
   0x4   :  { %p1252_p1 = scmp.lt.u32.totalorder %s1248_s22, %s1445_s1 }
   0x6   :  { %p1254_p2 = pnand %p1252_p1, %p1249_p0 }
   0x8   :  { %1257 = shalt.err (!%p1254_p2)
}
   0x9   :  { %s1258_s27 = scalar_lea.vmem %s31_s19, 8192  ;;  %p1263_p4 = scmp.lt.s32.totalorder %s31_s19, %s31_s19 }
   0xa   :  { %p1259_p3 = scmp.ne.s32.totalorder %s31_s19, %s1258_s27  ;;  %p1264_p5 = scmp.lt.s32.totalorder %s1258_s27, %s1258_s27 }
   0xc   :  { %p1265_p6 = por %p1264_p5, %p1263_p4 }
   0xe   :  { %p1266_p7 = pnand %p1265_p6, %p1259_p3 }
  0x10   :  { %1269 = shalt.err (!%p1266_p7)
}
  0x11   :  { %s1343_s28 = smov 64   ;;  %s1344_s29 = smov 4  }
  0x12   :  { %36 = dma.hbm_to_vmem [thread:$0]  %s1445_s1, 8192, %s31_s19, [#allocation6], %s1343_s28, %s1343_s28, %s1344_s29  }
  0x13   :  { %s1345_s7 = smov [#allocation2]   ;;  %s1270_s11 = scalar_lea.hbm %s1444_s0, 1024 }
  0x14   :  { %s18_s8 = sshll.u32 %s1345_s7, 4  ;;  %p1271_p8 = scmp.ne.s32.totalorder %s1444_s0, %s1270_s11  ;;  %s19_s8 = int_to_ptr.vmem [resolvable:$true] %s18_s8 }
  0x15   :  { %p1274_p9 = scmp.lt.u32.totalorder %s1270_s11, %s1444_s0 }
  0x17   :  { %p1276_p10 = pnand %p1274_p9, %p1271_p8 }
  0x19   :  { %1279 = shalt.err (!%p1276_p10)
}
  0x1a   :  { %s1280_s16 = scalar_lea.vmem %s19_s8, 1024  ;;  %p1285_p12 = scmp.lt.s32.totalorder %s19_s8, %s19_s8 }
  0x1b   :  { %p1281_p11 = scmp.ne.s32.totalorder %s19_s8, %s1280_s16  ;;  %p1286_p13 = scmp.lt.s32.totalorder %s1280_s16, %s1280_s16 }
  0x1d   :  { %p1287_p0 = por %p1286_p13, %p1285_p12 }
  0x1f   :  { %p1288_p1 = pnand %p1287_p0, %p1281_p11 }
  0x21   :  { %1291 = shalt.err (!%p1288_p1)
}
  0x22   :  { %s1346_s1 = smov 512   ;;  %s1347_s17 = smov 32  }
  0x23   :  { %24 = dma.hbm_to_vmem [thread:$0]  %s1444_s0, 1024, %s19_s8, [#allocation3], %s1346_s1, %s1346_s1, %s1347_s17  }
  0x24   :  { %s1348_s20 = smov [#allocation7]   ;;  %s1292_s24 = scalar_lea.hbm %s1447_s3, 1024 }
  0x25   :  { %s44_s21 = sshll.u32 %s1348_s20, 4  ;;  %p1293_p2 = scmp.ne.s32.totalorder %s1447_s3, %s1292_s24  ;;  %s45_s21 = int_to_ptr.vmem [resolvable:$true] %s44_s21 }
  0x26   :  { %p1296_p3 = scmp.lt.u32.totalorder %s1292_s24, %s1447_s3 }
  0x28   :  { %p1298_p4 = pnand %p1296_p3, %p1293_p2 }
  0x2a   :  { %1301 = shalt.err (!%p1298_p4)
}
  0x2b   :  { %s1302_s6 = scalar_lea.vmem %s45_s21, 1024  ;;  %p1307_p6 = scmp.lt.s32.totalorder %s45_s21, %s45_s21 }
  0x2c   :  { %p1303_p5 = scmp.ne.s32.totalorder %s45_s21, %s1302_s6  ;;  %p1308_p7 = scmp.lt.s32.totalorder %s1302_s6, %s1302_s6 }
  0x2e   :  { %p1309_p8 = por %p1308_p7, %p1307_p6 }
  0x30   :  { %p1310_p9 = pnand %p1309_p8, %p1303_p5 }
  0x32   :  { %1313 = shalt.err (!%p1310_p9)
}
  0x33   :  { %50 = dma.hbm_to_vmem [thread:$0]  %s1447_s3, 1024, %s45_s21, [#allocation6], %s1343_s28, %s1343_s28, %s1344_s29  }
  0x34   :  { %1336 = dma.done.wait [#allocation3], 1024  }
  0x35   :  { %1337 = vsyncadd [#allocation3], 4294966272 }
  0x36   :  { %1338 = dma.done.wait [#allocation6], 9216  }
  0x37   :  { %1339 = vsyncadd [#allocation6], 4294958080  ;;  %v1168_v0 = vld [vmem:[#allocation5 + $0x40] sm:$0xff]   ;;  %v1172_v4 = vld [vmem:[#allocation5 + $0x48] sm:$0xff]   ;;  %vm1350_vm0 = vmmov 0  }
  0x38   :  { %v1169_v1 = vld [vmem:[#allocation5 + $0xc0] sm:$0xff]   ;;  %1039 = vmatprep.subr.bf16.mxu0 %v1168_v0  ;;  %v1173_v5 = vld [vmem:[#allocation5 + $0xc8] sm:$0xff]   ;;  %v1176_v8 = vld [vmem:[#allocation5 + $0x50] sm:$0xff]  }
  0x39   :  { %v1170_v2 = vld [vmem:[#allocation5] sm:$0xff]   ;;  %1061 = vmatprep.subr.bf16.mxu1 %v1169_v1  ;;  %v1174_v6 = vld [vmem:[#allocation5 + $0x8] sm:$0xff]   ;;  %v1177_v9 = vld [vmem:[#allocation5 + $0xd0] sm:$0xff]  }
  0x3a   :  { %v1171_v3 = vld [vmem:[#allocation5 + $0x80] sm:$0xff]   ;;  %1040 = vmatpush3.bf16.msra.mxu0 %v1170_v2  ;;  %v1175_v7 = vld [vmem:[#allocation5 + $0x88] sm:$0xff]   ;;  %v1178_v10 = vld [vmem:[#allocation5 + $0x10] sm:$0xff]  }
  0x3b   :  { %1062 = vmatpush3.bf16.msra.mxu1 %v1171_v3  ;;  %1041 = vmatprep.subr.bf16.mxu0 %v1172_v4  ;;  %v1179_v11 = vld [vmem:[#allocation5 + $0x90] sm:$0xff]   ;;  %v1180_v12 = vld [vmem:[#allocation5 + $0x58] sm:$0xff]   ;;  %v1184_v16 = vld [vmem:[#allocation5 + $0x60] sm:$0xff]  }
  0x3c   :  { %1063 = vmatprep.subr.bf16.mxu1 %v1173_v5  ;;  %v1181_v13 = vld [vmem:[#allocation5 + $0xd8] sm:$0xff]   ;;  %v1185_v17 = vld [vmem:[#allocation5 + $0xe0] sm:$0xff]   ;;  %v1188_v20 = vld [vmem:[#allocation5 + $0x68] sm:$0xff]  }
  0x3d   :  { %v1182_v14 = vld [vmem:[#allocation5 + $0x18] sm:$0xff]   ;;  %v1186_v18 = vld [vmem:[#allocation5 + $0x20] sm:$0xff]   ;;  %v1189_v21 = vld [vmem:[#allocation5 + $0xe8] sm:$0xff]  }
  0x3e   :  { %1042 = vmatpush3.bf16.msra.mxu0 %v1174_v6  ;;  %v1183_v15 = vld [vmem:[#allocation5 + $0x98] sm:$0xff]   ;;  %v1187_v19 = vld [vmem:[#allocation5 + $0xa0] sm:$0xff]   ;;  %v1190_v22 = vld [vmem:[#allocation5 + $0x28] sm:$0xff]  }
  0x3f   :  { %1064 = vmatpush3.bf16.msra.mxu1 %v1175_v7  ;;  %1043 = vmatprep.subr.bf16.mxu0 %v1176_v8  ;;  %v1191_v23 = vld [vmem:[#allocation5 + $0xa8] sm:$0xff]   ;;  %v1192_v24 = vld [vmem:[#allocation5 + $0x70] sm:$0xff]   ;;  %v1196_v28 = vld [vmem:[#allocation5 + $0x78] sm:$0xff]  }
  0x40   :  { %1065 = vmatprep.subr.bf16.mxu1 %v1177_v9  ;;  %v1193_v25 = vld [vmem:[#allocation5 + $0xf0] sm:$0xff]   ;;  %v1197_v29 = vld [vmem:[#allocation5 + $0xf8] sm:$0xff]   ;;  %v63_v32 = vld [vmem:[#allocation2] sm:$0xff] }
  0x41   :  { %v1194_v26 = vld [vmem:[#allocation5 + $0x30] sm:$0xff]   ;;  %v1198_v30 = vld [vmem:[#allocation5 + $0x38] sm:$0xff]   ;;  %v67_v33 = vld [vmem:[#allocation2 + $0x20] sm:$0xff] }
  0x42   :  { %1044 = vmatpush3.bf16.msra.mxu0 %v1178_v10  ;;  %v1195_v27 = vld [vmem:[#allocation5 + $0xb0] sm:$0xff]   ;;  %v1199_v31 = vld [vmem:[#allocation5 + $0xb8] sm:$0xff]   ;;  %v64_v34 = vld [vmem:[#allocation2 + $0x8] sm:$0xff]  ;;  %v958_v35 = vcombine.low %v63_v32, %v67_v33  ;;  %v959_v36 = vcombine.high %v63_v32, %v67_v33 }
  0x43   :  { %1066 = vmatpush3.bf16.msra.mxu1 %v1179_v11  ;;  %1045 = vmatprep.subr.bf16.mxu0 %v1180_v12  ;;  %v68_v37 = vld [vmem:[#allocation2 + $0x28] sm:$0xff]  ;;  %v1200_v40 = vld [vmem:[#allocation5 + $0x140] sm:$0xff]   ;;  %v1208_v48 = vld [vmem:[#allocation5 + $0x150] sm:$0xff]  }
  0x44   :  { %1067 = vmatprep.subr.bf16.mxu1 %v1181_v13  ;;  %v960_v38 = vcombine.low %v64_v34, %v68_v37  ;;  %v961_v39 = vcombine.high %v64_v34, %v68_v37  ;;  %662 = vmatprep.mubr.bf16.mxu0 %v959_v36  ;;  %v1201_v41 = vld [vmem:[#allocation5 + $0x1c0] sm:$0xff]   ;;  %v1204_v44 = vld [vmem:[#allocation5 + $0x148] sm:$0xff]   ;;  %v1209_v49 = vld [vmem:[#allocation5 + $0x1d0] sm:$0xff]  }
  0x45   :  { %v1202_v42 = vld [vmem:[#allocation5 + $0x100] sm:$0xff]   ;;  %v1205_v45 = vld [vmem:[#allocation5 + $0x1c8] sm:$0xff]   ;;  %v1210_v50 = vld [vmem:[#allocation5 + $0x110] sm:$0xff]  }
  0x46   :  { %1046 = vmatpush3.bf16.msra.mxu0 %v1182_v14  ;;  %703 = vmatprep.mubr.bf16.mxu1 %v961_v39  ;;  %v1203_v43 = vld [vmem:[#allocation5 + $0x180] sm:$0xff]   ;;  %v1206_v46 = vld [vmem:[#allocation5 + $0x108] sm:$0xff]   ;;  %v1211_v51 = vld [vmem:[#allocation5 + $0x190] sm:$0xff]  }
  0x47   :  { %1068 = vmatpush3.bf16.msra.mxu1 %v1183_v15  ;;  %1047 = vmatprep.subr.bf16.mxu0 %v1184_v16  ;;  %v1207_v47 = vld [vmem:[#allocation5 + $0x188] sm:$0xff]   ;;  %v1212_v52 = vld [vmem:[#allocation5 + $0x158] sm:$0xff]   ;;  %v1216_v56 = vld [vmem:[#allocation5 + $0x160] sm:$0xff]  }
  0x48   :  { %1069 = vmatprep.subr.bf16.mxu1 %v1185_v17  ;;  %v1213_v53 = vld [vmem:[#allocation5 + $0x1d8] sm:$0xff]   ;;  %v1217_v57 = vld [vmem:[#allocation5 + $0x1e0] sm:$0xff]   ;;  %v1220_v60 = vld [vmem:[#allocation5 + $0x168] sm:$0xff]   ;;  %v1349_v17 = vmov 0.0  }
  0x49   :  { %v1214_v54 = vld [vmem:[#allocation5 + $0x118] sm:$0xff]   ;;  %v1218_v58 = vld [vmem:[#allocation5 + $0x120] sm:$0xff]   ;;  %v1221_v61 = vld [vmem:[#allocation5 + $0x1e8] sm:$0xff]  }
  0x4a   :  { %1048 = vmatpush3.bf16.msra.mxu0 %v1186_v18  ;;  %v1215_v55 = vld [vmem:[#allocation5 + $0x198] sm:$0xff]   ;;  %v1219_v59 = vld [vmem:[#allocation5 + $0x1a0] sm:$0xff]   ;;  %v1222_v62 = vld [vmem:[#allocation5 + $0x128] sm:$0xff]  }
  0x4b   :  { %1070 = vmatpush3.bf16.msra.mxu1 %v1187_v19  ;;  %1049 = vmatprep.subr.bf16.mxu0 %v1188_v20  ;;  %v1223_v63 = vld [vmem:[#allocation5 + $0x1a8] sm:$0xff]   ;;  %v1224_v0 = vld [vmem:[#allocation5 + $0x170] sm:$0xff]   ;;  %v1228_v4 = vld [vmem:[#allocation5 + $0x178] sm:$0xff]  }
  0x4c   :  { %1071 = vmatprep.subr.bf16.mxu1 %v1189_v21  ;;  %v1225_v1 = vld [vmem:[#allocation5 + $0x1f0] sm:$0xff]   ;;  %v1229_v5 = vld [vmem:[#allocation5 + $0x1f8] sm:$0xff]   ;;  %v1232_v16 = vld [vmem:[#allocation7] sm:$0xff]  }
  0x4d   :  { %v1226_v2 = vld [vmem:[#allocation5 + $0x130] sm:$0xff]   ;;  %v1230_v6 = vld [vmem:[#allocation5 + $0x138] sm:$0xff]   ;;  %v1233_v18 = vld [vmem:[#allocation7 + $0x8] sm:$0xff]  }
  0x4e   :  { %1050 = vmatpush3.bf16.msra.mxu0 %v1190_v22  ;;  %v1227_v3 = vld [vmem:[#allocation5 + $0x1b0] sm:$0xff]   ;;  %v1231_v7 = vld [vmem:[#allocation5 + $0x1b8] sm:$0xff]   ;;  %v1236_v21 = vld [vmem:[#allocation7 + $0x20] sm:$0xff]  }
  0x4f   :  { %1072 = vmatpush3.bf16.msra.mxu1 %v1191_v23  ;;  %1051 = vmatprep.subr.bf16.mxu0 %v1192_v24  ;;  %v65_v8 = vld [vmem:[#allocation2 + $0x10] sm:$0xff]  ;;  %v66_v12 = vld [vmem:[#allocation2 + $0x18] sm:$0xff]  ;;  %v1237_v22 = vld [vmem:[#allocation7 + $0x28] sm:$0xff]  }
  0x50   :  { %1073 = vmatprep.subr.bf16.mxu1 %v1193_v25  ;;  %v69_v9 = vld [vmem:[#allocation2 + $0x30] sm:$0xff]  ;;  %v70_v13 = vld [vmem:[#allocation2 + $0x38] sm:$0xff] }
  0x51   :  { %v962_v10 = vcombine.low %v65_v8, %v69_v9  ;;  %v963_v11 = vcombine.high %v65_v8, %v69_v9  ;;  %v964_v14 = vcombine.low %v66_v12, %v70_v13  ;;  %v965_v15 = vcombine.high %v66_v12, %v70_v13  ;;  %v1234_v19 = vld [vmem:[#allocation7 + $0x10] sm:$0xff]   ;;  %v1235_v20 = vld [vmem:[#allocation7 + $0x18] sm:$0xff]  }
  0x52   :  { %1052 = vmatpush3.bf16.msra.mxu0 %v1194_v26  ;;  %v1238_v23 = vld [vmem:[#allocation7 + $0x30] sm:$0xff]   ;;  %v1239_v24 = vld [vmem:[#allocation7 + $0x38] sm:$0xff]  }
  0x53   :  { %1074 = vmatpush3.bf16.msra.mxu1 %v1195_v27  ;;  %1053 = vmatprep.subr.bf16.mxu0 %v1196_v28  ;;  %v957_v27 = vld [vmem:[%s1446_s2] ss:$0 sm:$0xff] }
  0x54   :  { %1075 = vmatprep.subr.bf16.mxu1 %v1197_v29 }
  0x56   :  { %1054 = vmatpush3.bf16.msra.mxu0 %v1198_v30 }
  0x57   :  { %1076 = vmatpush3.bf16.msra.mxu1 %v1199_v31  ;;  %1083 = vmatprep.subr.bf16.mxu0 %v1200_v40 }
  0x58   :  { %1105 = vmatprep.subr.bf16.mxu1 %v1201_v41 }
  0x59   :  { %663 = vmatmul.mubr.bf16.vlgmr.msra.gmra.mrb[0].mxu0 %v958_v35 }
  0x5a   :  { %704 = vmatmul.mubr.bf16.vlgmr.msra.gmra.mrb[0].mxu1 %v960_v38  ;;  %1084 = vmatpush3.bf16.msra.mxu0 %v1202_v42 }
  0x5b   :  { %1106 = vmatpush3.bf16.msra.mxu1 %v1203_v43  ;;  %1085 = vmatprep.subr.bf16.mxu0 %v1204_v44 }
  0x5c   :  { %1107 = vmatprep.subr.bf16.mxu1 %v1205_v45  ;;  %744 = vmatprep.mubr.bf16.mxu0 %v963_v11 }
  0x5d   :  { %785 = vmatprep.mubr.bf16.mxu1 %v965_v15 }
  0x5e   :  { %1086 = vmatpush3.bf16.msra.mxu0 %v1206_v46 }
  0x5f   :  { %1108 = vmatpush3.bf16.msra.mxu1 %v1207_v47  ;;  %1087 = vmatprep.subr.bf16.mxu0 %v1208_v48 }
  0x60   :  { %1109 = vmatprep.subr.bf16.mxu1 %v1209_v49 }
  0x62   :  { %1088 = vmatpush3.bf16.msra.mxu0 %v1210_v50 }
  0x63   :  { %1110 = vmatpush3.bf16.msra.mxu1 %v1211_v51  ;;  %1089 = vmatprep.subr.bf16.mxu0 %v1212_v52 }
  0x64   :  { %1111 = vmatprep.subr.bf16.mxu1 %v1213_v53 }
  0x66   :  { %1090 = vmatpush3.bf16.msra.mxu0 %v1214_v54 }
  0x67   :  { %1112 = vmatpush3.bf16.msra.mxu1 %v1215_v55  ;;  %1091 = vmatprep.subr.bf16.mxu0 %v1216_v56 }
  0x68   :  { %1113 = vmatprep.subr.bf16.mxu1 %v1217_v57 }
  0x6a   :  { %1092 = vmatpush3.bf16.msra.mxu0 %v1218_v58 }
  0x6b   :  { %1114 = vmatpush3.bf16.msra.mxu1 %v1219_v59  ;;  %1093 = vmatprep.subr.bf16.mxu0 %v1220_v60 }
  0x6c   :  { %1115 = vmatprep.subr.bf16.mxu1 %v1221_v61  ;;  %v909_v61 = vlaneseq }
  0x6e   :  { %1094 = vmatpush3.bf16.msra.mxu0 %v1222_v62  ;;  %v910_v62 = vand.u32 127, %v909_v61 }
  0x6f   :  { %1116 = vmatpush3.bf16.msra.mxu1 %v1223_v63  ;;  %1095 = vmatprep.subr.bf16.mxu0 %v1224_v0  ;;  %v1030_v63 = vld [vmem:[%s1448_s4] ss:$0 sm:$0xff]  ;;  %s1351_s4 = smov [#allocation8]  }
  0x70   :  { %1117 = vmatprep.subr.bf16.mxu1 %v1225_v1  ;;  %vm911_vm1 = vcmp.lt.s32.totalorder %v910_v62, 16  ;;  %vm934_vm2 = vcmp.eq.s32.totalorder %v910_v62, 16  ;;  %s944_s8 = sshll.u32 %s1351_s4, 4  ;;  %s945_s8 = int_to_ptr.vmem [resolvable:$true] %s944_s8 }
  0x71   :  { %s1314_s9 = scalar_lea.vmem %s945_s8, 256  ;;  %p1319_p11 = scmp.lt.s32.totalorder %s945_s8, %s945_s8 }
  0x72   :  { %1096 = vmatpush3.bf16.msra.mxu0 %v1226_v2  ;;  %p1315_p10 = scmp.ne.s32.totalorder %s945_s8, %s1314_s9  ;;  %p1320_p12 = scmp.lt.s32.totalorder %s1314_s9, %s1314_s9 }
  0x73   :  { %1118 = vmatpush3.bf16.msra.mxu1 %v1227_v3  ;;  %1097 = vmatprep.subr.bf16.mxu0 %v1228_v4 }
  0x74   :  { %1119 = vmatprep.subr.bf16.mxu1 %v1229_v5  ;;  %p1321_p13 = por %p1320_p12, %p1319_p11 }
  0x76   :  { %1098 = vmatpush3.bf16.msra.mxu0 %v1230_v6  ;;  %p1322_p0 = pnand %p1321_p13, %p1315_p10 }
  0x77   :  { %1120 = vmatpush3.bf16.msra.mxu1 %v1231_v7  ;;  %1136 = vmatprep.subr.bf16.mxu0 %v1349_v17 }
  0x79   :  { %745 = vmatmul.mubr.bf16.vlgmr.msra.gmra.mrb[4].mxu0 %v962_v10 }
  0x7a   :  { %786 = vmatmul.mubr.bf16.vlgmr.msra.gmra.mrb[4].mxu1 %v964_v14  ;;  %1137 = vmatpush3.bf16.msra.mxu0 %v1232_v16 }
  0x7b   :  { %1138 = vmatprep.subr.bf16.mxu0 %v1349_v17  ;;  %1152 = vmatprep.mubr.msk.bf16.mxu0 %vm1350_vm0, %v1349_v17 }
  0x7e   :  { %1139 = vmatpush3.bf16.msra.mxu0 %v1233_v18 }
  0x7f   :  { %1140 = vmatprep.subr.bf16.mxu0 %v1349_v17 }
  0x82   :  { %1141 = vmatpush3.bf16.msra.mxu0 %v1234_v19 }
  0x83   :  { %1142 = vmatprep.subr.bf16.mxu0 %v1349_v17 }
  0x86   :  { %1143 = vmatpush3.bf16.msra.mxu0 %v1235_v20 }
  0x87   :  { %1144 = vmatprep.subr.bf16.mxu0 %v1349_v17 }
  0x8a   :  { %1145 = vmatpush3.bf16.msra.mxu0 %v1236_v21 }
  0x8b   :  { %1146 = vmatprep.subr.bf16.mxu0 %v1349_v17 }
  0x8e   :  { %1147 = vmatpush3.bf16.msra.mxu0 %v1237_v22 }
  0x8f   :  { %1148 = vmatprep.subr.bf16.mxu0 %v1349_v17 }
  0x92   :  { %1149 = vmatpush3.bf16.msra.mxu0 %v1238_v23 }
  0x93   :  { %1150 = vmatprep.subr.bf16.mxu0 %v1349_v17 }
  0x96   :  { %1151 = vmatpush3.bf16.msra.mxu0 %v1239_v24 }
 0x12c   :  { %v1055_v25 = vpop.f32.mrb[0].mxu0 }
 0x12d   :  { %v1077_v26 = vpop.f32.mrb[0].mxu1  ;;  %v1056_v28 = vpop.f32.mrb[1].mxu0 }
 0x12e   :  { %v1057_v29 = vadd.f32 %v1056_v28, %v1055_v25  ;;  %v1078_v30 = vpop.f32.mrb[1].mxu1  ;;  %v1058_v31 = vpop.f32.mrb[2].mxu0 }
 0x12f   :  { %v1079_v32 = vadd.f32 %v1078_v30, %v1077_v26  ;;  %v1080_v33 = vpop.f32.mrb[2].mxu1  ;;  %v1059_v34 = vpop.f32.mrb[3].mxu0 }
 0x130   :  { %v665_v35 = vadd.f32 %v1057_v29, %v957_v27  ;;  %v1060_v36 = vadd.f32 %v1059_v34, %v1058_v31  ;;  %v1081_v37 = vpop.f32.mrb[3].mxu1 }
 0x131   :  { %v1082_v38 = vadd.f32 %v1081_v37, %v1080_v33 }
 0x132   :  { %v706_v39 = vadd.f32 %v1079_v32, %v665_v35  ;;  %v668_v40 = vadd.f32 %v1060_v36, %v957_v27 }
 0x134   :  { %v709_v41 = vadd.f32 %v1082_v38, %v668_v40 }
 0x14c   :  { %v1099_v42 = vpop.f32.mrb[4].mxu0 }
 0x14d   :  { %v1121_v43 = vpop.f32.mrb[4].mxu1  ;;  %v1100_v44 = vpop.f32.mrb[5].mxu0 }
 0x14e   :  { %v1101_v45 = vadd.f32 %v1100_v44, %v1099_v42  ;;  %v1122_v46 = vpop.f32.mrb[5].mxu1  ;;  %v1102_v47 = vpop.f32.mrb[6].mxu0 }
 0x14f   :  { %v1123_v48 = vadd.f32 %v1122_v46, %v1121_v43  ;;  %v1124_v49 = vpop.f32.mrb[6].mxu1  ;;  %v1103_v50 = vpop.f32.mrb[7].mxu0 }
 0x150   :  { %v747_v51 = vadd.f32 %v1101_v45, %v706_v39  ;;  %v1104_v52 = vadd.f32 %v1103_v50, %v1102_v47  ;;  %v1125_v53 = vpop.f32.mrb[7].mxu1 }
 0x151   :  { %v1126_v54 = vadd.f32 %v1125_v53, %v1124_v49 }
 0x152   :  { %v788_v55 = vadd.f32 %v1123_v48, %v747_v51  ;;  %v750_v56 = vadd.f32 %v1104_v52, %v709_v41 }
 0x154   :  { %v791_v57 = vadd.f32 %v1126_v54, %v750_v56  ;;  %v794_v58 = vmax.f32 %v788_v55, 0.0 }
 0x156   :  { %v795_v59 = vmax.f32 %v791_v57, 0.0 }
 0x158   :  { %v796_v60 = vpack.c.bf16 %v795_v59, %v794_v58 }
 0x15a   :  { %1153 = vmatmul.mubr.bf16.vlgmr.msra.gmra.mrb[8].mxu0 %v796_v60 }
 0x22d   :  { %v902_v0 = vpop.f32.mrb[8].mxu0 }
 0x22e   :  { %v903_v1 = vadd.f32 %v1030_v63, %v902_v0  ;;  %v1154_v2 = vpop.f32.mrb[9].mxu0 }
 0x22f   :  { %v905_v3 = vpop.f32.mrb[10].mxu0 }
 0x230   :  { %v906_v4 = vadd.f32 %v1030_v63, %v905_v3  ;;  %v1155_v5 = vpop.f32.mrb[11].mxu0  ;;  %v912_v6 = vsel %vm911_vm1, %v903_v1, -inf }
 0x231   :  { %914 = vmax.xlane.f32.xlu0 %v912_v6 }
 0x232   :  { %v913_v7 = vsel %vm911_vm1, %v906_v4, -inf }
 0x235   :  { %916 = vmax.xlane.f32.xlu0 %v913_v7 }
 0x2be   :  { %v915_v8 = vpop.xlane.xlu0 %914 }
 0x2bf   :  { %v918_v9 = vsub.f32 %v912_v6, %v915_v8 }
 0x2c1   :  { %v920_v10 = vmul.f32 1.442695, %v918_v9 }
 0x2c2   :  { %v917_v11 = vpop.xlane.xlu0 %916 }
 0x2c3   :  { %v919_v12 = vsub.f32 %v913_v7, %v917_v11  ;;  %1240 = vpow2.f32 %v920_v10 }
 0x2c5   :  { %v922_v13 = vmul.f32 1.442695, %v919_v12 }
 0x2c7   :  { %1242 = vpow2.f32 %v922_v13 }
 0x2cd   :  { %v1241_v14 = vpop.eup %1240 }
 0x2ce   :  { %924 = vadd.xlane.f32.xlu1 %v1241_v14 }
 0x2d1   :  { %v1243_v15 = vpop.eup %1242 }
 0x2d2   :  { %926 = vadd.xlane.f32.xlu1 %v1243_v15 }
 0x35b   :  { %v925_v16 = vpop.xlane.xlu1 %924 }
 0x35c   :  { %1244 = vlog2.f32 %v925_v16 }
 0x35f   :  { %v927_v17 = vpop.xlane.xlu1 %926 }
 0x360   :  { %1246 = vlog2.f32 %v927_v17 }
 0x366   :  { %v1245_v18 = vpop.eup %1244 }
 0x367   :  { %v929_v19 = vmul.f32 0.6931472, %v1245_v18 }
 0x369   :  { %v932_v20 = vsub.f32 %v918_v9, %v929_v19 }
 0x36a   :  { %v1247_v21 = vpop.eup %1246 }
 0x36b   :  { %v931_v22 = vmul.f32 0.6931472, %v1247_v21  ;;  %v935_v23 = vsel %vm934_vm2, %v903_v1, %v932_v20 }
 0x36c   :  { %937 = vst [vmem:[#allocation8] sm:$0xff] %v935_v23 }
 0x36d   :  { %v933_v24 = vsub.f32 %v919_v12, %v931_v22 }
 0x36f   :  { %v936_v25 = vsel %vm934_vm2, %v906_v4, %v933_v24 }
 0x370   :  { %938 = vst [vmem:[#allocation8 + $0x8] sm:$0xff] %v936_v25 }
 0x371   :  { %1325 = shalt.err (!%p1322_p0)
}
 0x372   :  { %s1326_s12 = scalar_lea.hbm %s1449_s5, 256 }
 0x373   :  { %p1327_p1 = scmp.ne.s32.totalorder %s1449_s5, %s1326_s12  ;;  %p1330_p2 = scmp.lt.u32.totalorder %s1326_s12, %s1449_s5 }
 0x375   :  { %p1332_p3 = pnand %p1330_p2, %p1327_p1 }
 0x377   :  { %1335 = shalt.err (!%p1332_p3)
}
 0x378   :  { %s1352_s1 = smov 128   ;;  %s1353_s17 = smov 8  }
 0x379   :  { %950 = dma.vmem_to_hbm [thread:$0]  %s945_s8, 256, %s1449_s5, [#allocation4], %s1352_s1, %s1352_s1, %s1353_s17  }
 0x37a   :  { %1340 = dma.done.wait [#allocation4], 256  }
 0x37b   :  { %1341 = vsyncadd [#allocation4], 4294967040 }
 0x37c   :  { %954 = vsyncpa [#allocation3], 1 }
 0x37d   :  { %955 = vsyncpa [#allocation6], 1 }
 0x37e   :  { %956 = vsyncpa [#allocation4], 1 }

</bundles_post_ra>
